<compile_context>
chip_gen: v6e
topology: v6e:2x2x1
jax: 0.10.0
libtpu: 0.0.40
codegen_flags: <defaults>
</compile_context>

<pallas_src>
import functools

import jax
import jax.numpy as jnp
from jax.experimental import pallas as pl
from jax.experimental.pallas import tpu as pltpu

_PAD = 128  # lane-aligned halo pad on each side of the flattened pixel axis


# ------------------------------ fused kernel ------------------------------
def _vanilla_fused_kernel(x_ref, wc_ref, bc_ref, wh_ref, bh_ref,
                          feat_ref, emb_ref, xpad_ref, slab_ref, *, width):
    """One image per grid step: conv3x3(pad=1)+ReLU -> features; GAP+Linear -> embedding.

    x_ref   : (1, Cin, H*W)        image, pixels on the lane axis
    wc_ref  : (Cout, 9*Cin)        conv weights, tap-major rows ((ky*3+kx)*Cin + ci)
    bc_ref  : (Cout, 1)
    wh_ref  : (D, Cout)            head Linear weight (native PyTorch layout)
    bh_ref  : (D, 1)
    feat_ref: (1, Cout, H*W)       lane-dense feature output
    emb_ref : (1, D, 1)            embedding output (column form)
    xpad_ref: (Cin, H*W + 2*_PAD)  VMEM scratch: zero-padded pixel axis (vertical halo)
    slab_ref: (9*Cin, H*W)         VMEM scratch: im2col patch slab
    """
    cin, hw = x_ref.shape[1], x_ref.shape[2]
    w = width

    # Zero-padded copy of the image along the flattened pixel axis.  All three stores
    # start at multiples of 128 lanes (unmasked vst); out-of-image rows (vertical halo)
    # then read zeros with no extra masking.
    xpad_ref[:, 0:_PAD] = jnp.zeros((cin, _PAD), jnp.float32)
    xpad_ref[:, _PAD:_PAD + hw] = x_ref[0]
    xpad_ref[:, _PAD + hw:_PAD + hw + _PAD] = jnp.zeros((cin, _PAD), jnp.float32)

    # Column index of every output pixel (lane iota); masks horizontal wrap-around.
    # Hoisted out of the tap loop (no CSE of broadcast/iota across iterations).
    col = jax.lax.broadcasted_iota(jnp.int32, (cin, hw), 1) % w
    left_ok = col >= 1           # tap at kx=0  (ox = -1) valid only for x >= 1
    right_ok = col <= w - 2      # tap at kx=2  (ox = +1) valid only for x <= W-2

    # im2col: 9 lane-shifted windows, column-masked, packed into the (9*Cin, HW) slab.
    for t in range(9):
        oy, ox = t // 3 - 1, t % 3 - 1
        shift = oy * w + ox
        patch = xpad_ref[:, _PAD + shift:_PAD + shift + hw]   # (Cin, HW): x[:, p+shift]
        if ox == -1:
            patch = jnp.where(left_ok, patch, 0.0)
        elif ox == 1:
            patch = jnp.where(right_ok, patch, 0.0)
        slab_ref[t * cin:(t + 1) * cin, :] = patch

    # Conv as a single MXU matmul + bias + ReLU; result is already (Cout, HW) lane-dense.
    acc = jnp.dot(wc_ref[...], slab_ref[...], preferred_element_type=jnp.float32)
    feat = jnp.maximum(acc + bc_ref[...], 0.0)
    feat_ref[0] = feat

    # Head: Linear(GAP(feat)) == mean_p(Wh @ feat) by linearity -> one well-shaped
    # (D, Cout) x (Cout, HW) matmul + a cheap lane reduction * compile-time 1/(H*W).
    hp = jnp.dot(wh_ref[...], feat, preferred_element_type=jnp.float32)   # (D, HW)
    emb_ref[0] = jnp.sum(hp, axis=1, keepdims=True) * (1.0 / hw) + bh_ref[...]


# ------------------------------ host wrappers ------------------------------
def prepare_params(conv_w_oihw, conv_b, head_w, head_b):
    """One-time transform: PyTorch-layout weights -> kernel layouts."""
    cout, cin, kh, kw = conv_w_oihw.shape
    # OIHW -> (Cout, kH, kW, Cin) -> (Cout, 9*Cin), row index (ky*3+kx)*Cin + ci.
    wc = jnp.transpose(conv_w_oihw, (0, 2, 3, 1)).reshape(cout, kh * kw * cin)
    return {
        "conv_w": wc,                         # (Cout, 9*Cin)
        "conv_b": conv_b.reshape(cout, 1),    # (Cout, 1)
        "head_w": head_w,                     # (D, Cout), PyTorch layout as-is
        "head_b": head_b.reshape(-1, 1),      # (D, 1)
    }


def vanilla_forward(x_nchw, params):
    """Mirrors Vanilla.forward: {'backbone': features (NCHW), 'head': embeddings (N, D)}."""
    n, cin, h, w = x_nchw.shape
    cout = params["conv_w"].shape[0]
    d = params["head_w"].shape[0]
    hw = h * w
    assert w + 1 <= _PAD, "halo pad must cover the max tap shift (W + 1)"

    x_rows = x_nchw.reshape(n, cin, hw)       # free reshape; no transposes anywhere

    kernel = functools.partial(_vanilla_fused_kernel, width=w)
    feat, emb = pl.pallas_call(
        kernel,
        out_shape=(
            jax.ShapeDtypeStruct((n, cout, hw), jnp.float32),
            jax.ShapeDtypeStruct((n, d, 1), jnp.float32),
        ),
        grid_spec=pltpu.PrefetchScalarGridSpec(
            num_scalar_prefetch=0,
            grid=(n,),
            in_specs=[
                pl.BlockSpec((1, cin, hw), lambda i: (i, 0, 0)),
                pl.BlockSpec((cout, 9 * cin), lambda i: (0, 0)),
                pl.BlockSpec((cout, 1), lambda i: (0, 0)),
                pl.BlockSpec((d, cout), lambda i: (0, 0)),
                pl.BlockSpec((d, 1), lambda i: (0, 0)),
            ],
            out_specs=[
                pl.BlockSpec((1, cout, hw), lambda i: (i, 0, 0)),
                pl.BlockSpec((1, d, 1), lambda i: (i, 0, 0)),
            ],
            scratch_shapes=[
                pltpu.VMEM((cin, hw + 2 * _PAD), jnp.float32),  # padded image
                pltpu.VMEM((9 * cin, hw), jnp.float32),         # im2col slab
            ],
        ),
        compiler_params=pltpu.CompilerParams(
            dimension_semantics=("parallel",)),
    )(x_rows, params["conv_w"], params["conv_b"],
      params["head_w"], params["head_b"])

    return {"backbone": feat.reshape(n, cout, h, w), "head": emb.reshape(n, d)}


# --------------------------------- reference ---------------------------------
def vanilla_reference(x_nchw, conv_w_oihw, conv_b, head_w, head_b):
    conv = jax.lax.conv_general_dilated(
        x_nchw, conv_w_oihw, window_strides=(1, 1), padding="SAME",
        dimension_numbers=("NCHW", "OIHW", "NCHW"))
    feats = jnp.maximum(conv + conv_b[None, :, None, None], 0.0)
    pooled = jnp.mean(feats, axis=(2, 3))
    emb = pooled @ head_w.T + head_b[None, :]
    return {"backbone": feats, "head": emb}


if __name__ == "__main__":
    N, Cin, H, W = 2, 4, 16, 16
    Cf, D = 32, 8

    key = jax.random.PRNGKey(0)
    k_x, k_cw, k_cb, k_hw, k_hb = jax.random.split(key, 5)

    x = jax.random.normal(k_x, (N, Cin, H, W), dtype=jnp.float32)

    # PyTorch-layout parameters: conv (Cf, Cin, 3, 3), linear (D, Cf).
    conv_w = jax.random.normal(k_cw, (Cf, Cin, 3, 3), jnp.float32) * 0.1
    conv_b = jax.random.normal(k_cb, (Cf,), jnp.float32) * 0.1
    head_w = jax.random.normal(k_hw, (D, Cf), jnp.float32) * 0.1
    head_b = jax.random.normal(k_hb, (D,), jnp.float32) * 0.1

    params = prepare_params(conv_w, conv_b, head_w, head_b)
    out = jax.block_until_ready(vanilla_forward(x, params))

    ref = vanilla_reference(x, conv_w, conv_b, head_w, head_b)
    assert out["backbone"].shape == (N, Cf, H, W)
    assert out["head"].shape == (N, D)
    assert jnp.allclose(out["backbone"], ref["backbone"], atol=1e-4, rtol=1e-4)
    assert jnp.allclose(out["head"], ref["head"], atol=1e-4, rtol=1e-4)

    print("KERNEL_OK")
</pallas_src>

<mosaic_0001>
module attributes {stable_mosaic.version = 11 : i64} {
  func.func @_vanilla_fused_kernel(%arg0: i32, %arg1: memref<1x4x256xf32, #tpu.memory_space<vmem>>, %arg2: memref<32x36xf32, #tpu.memory_space<vmem>>, %arg3: memref<32x1xf32, #tpu.memory_space<vmem>>, %arg4: memref<8x32xf32, #tpu.memory_space<vmem>>, %arg5: memref<8x1xf32, #tpu.memory_space<vmem>>, %arg6: memref<1x32x256xf32, #tpu.memory_space<vmem>>, %arg7: memref<1x8x1xf32, #tpu.memory_space<vmem>>, %arg8: memref<4x512xf32, #tpu.memory_space<vmem>>, %arg9: memref<36x256xf32, #tpu.memory_space<vmem>>) attributes {dimension_semantics = [#tpu.dimension_semantics<parallel>], iteration_bounds = array<i64: 2>, scalar_prefetch = 0 : i64, scratch_operands = 2 : i64, tpu.core_type = #tpu.core_type<tc>, window_params = [{transform_indices = @transform_0, window_bounds = array<i64: 1, 4, 256>}, {pipeline_mode = #tpu.pipeline_mode<synchronous>, transform_indices = @transform_1, window_bounds = array<i64: 32, 36>}, {pipeline_mode = #tpu.pipeline_mode<synchronous>, transform_indices = @transform_2, window_bounds = array<i64: 32, 1>}, {pipeline_mode = #tpu.pipeline_mode<synchronous>, transform_indices = @transform_3, window_bounds = array<i64: 8, 32>}, {pipeline_mode = #tpu.pipeline_mode<synchronous>, transform_indices = @transform_4, window_bounds = array<i64: 8, 1>}, {transform_indices = @transform_5, window_bounds = array<i64: 1, 32, 256>}, {transform_indices = @transform_6, window_bounds = array<i64: 1, 8, 1>}]} {
    %cst = arith.constant 0.000000e+00 : f32
    %0 = vector.broadcast %cst : f32 to vector<4x128xf32>
    %c0 = arith.constant 0 : index
    %c0_0 = arith.constant 0 : index
    %1 = vector.load %arg8[%c0, %c0_0] : memref<4x512xf32, #tpu.memory_space<vmem>>, vector<4x128xf32>
    tpu.vector_store %arg8[%c0, %c0_0], %0 {strides = array<i32>} : memref<4x512xf32, #tpu.memory_space<vmem>>, vector<4x128xf32>,
    %c0_1 = arith.constant 0 : index
    %c0_2 = arith.constant 0 : index
    %c0_3 = arith.constant 0 : index
    %2 = vector.load %arg1[%c0_1, %c0_2, %c0_3] : memref<1x4x256xf32, #tpu.memory_space<vmem>>, vector<1x4x256xf32>
    %3 = vector.shape_cast %2 : vector<1x4x256xf32> to vector<4x256xf32>
    %c0_4 = arith.constant 0 : index
    %c128 = arith.constant 128 : index
    %4 = vector.load %arg8[%c0_4, %c128] : memref<4x512xf32, #tpu.memory_space<vmem>>, vector<4x256xf32>
    tpu.vector_store %arg8[%c0_4, %c128], %3 {strides = array<i32>} : memref<4x512xf32, #tpu.memory_space<vmem>>, vector<4x256xf32>,
    %cst_5 = arith.constant 0.000000e+00 : f32
    %5 = vector.broadcast %cst_5 : f32 to vector<4x128xf32>
    %c0_6 = arith.constant 0 : index
    %c384 = arith.constant 384 : index
    %6 = vector.load %arg8[%c0_6, %c384] : memref<4x512xf32, #tpu.memory_space<vmem>>, vector<4x128xf32>
    tpu.vector_store %arg8[%c0_6, %c384], %5 {strides = array<i32>} : memref<4x512xf32, #tpu.memory_space<vmem>>, vector<4x128xf32>,
    %7 = tpu.iota {dimensions = array<i32: 1>} : vector<4x256xi32>
    %c16_i32 = arith.constant 16 : i32
    %c0_i32 = arith.constant 0 : i32
    %8 = arith.cmpi eq, %c16_i32, %c0_i32 : i32
    %c1_i32 = arith.constant 1 : i32
    %9 = arith.select %8, %c1_i32, %c16_i32 : i32
    %10 = vector.broadcast %9 : i32 to vector<4x256xi32>
    %11 = arith.remsi %7, %10 : vector<4x256xi32>
    %c0_i32_7 = arith.constant 0 : i32
    %12 = vector.broadcast %c0_i32_7 : i32 to vector<4x256xi32>
    %13 = arith.cmpi ne, %11, %12 : vector<4x256xi32>
    %c0_i32_8 = arith.constant 0 : i32
    %14 = vector.broadcast %c0_i32_8 : i32 to vector<4x256xi32>
    %15 = arith.cmpi slt, %11, %14 : vector<4x256xi32>
    %c0_i32_9 = arith.constant 0 : i32
    %16 = arith.cmpi slt, %9, %c0_i32_9 : i32
    %17 = vector.broadcast %16 : i1 to vector<4x256xi1>
    %18 = vector.broadcast %17 : vector<4x256xi1> to vector<4x256xi1>
    %19 = arith.xori %15, %18 : vector<4x256xi1>
    %20 = arith.andi %19, %13 : vector<4x256xi1>
    %21 = vector.broadcast %9 : i32 to vector<4x256xi32>
    %22 = arith.addi %11, %21 : vector<4x256xi32>
    %23 = arith.select %20, %22, %11 : vector<4x256xi1>, vector<4x256xi32>
    %c1_i32_10 = arith.constant 1 : i32
    %24 = vector.broadcast %c1_i32_10 : i32 to vector<4x256xi32>
    %25 = arith.cmpi sge, %23, %24 : vector<4x256xi32>
    %c14_i32 = arith.constant 14 : i32
    %26 = vector.broadcast %c14_i32 : i32 to vector<4x256xi32>
    %27 = arith.cmpi sle, %23, %26 : vector<4x256xi32>
    %c0_11 = arith.constant 0 : index
    %c111 = arith.constant 111 : index
    %28 = vector.load %arg8[%c0_11, %c111] : memref<4x512xf32, #tpu.memory_space<vmem>>, vector<4x256xf32>
    %cst_12 = arith.constant 0.000000e+00 : f32
    %29 = vector.broadcast %cst_12 : f32 to vector<4x256xf32>
    %30 = arith.select %25, %28, %29 : vector<4x256xi1>, vector<4x256xf32>
    %c0_13 = arith.constant 0 : index
    %c0_14 = arith.constant 0 : index
    %31 = vector.load %arg9[%c0_13, %c0_14] : memref<36x256xf32, #tpu.memory_space<vmem>>, vector<4x256xf32>
    tpu.vector_store %arg9[%c0_13, %c0_14], %30 {strides = array<i32>} : memref<36x256xf32, #tpu.memory_space<vmem>>, vector<4x256xf32>,
    %c0_15 = arith.constant 0 : index
    %c112 = arith.constant 112 : index
    %32 = vector.load %arg8[%c0_15, %c112] : memref<4x512xf32, #tpu.memory_space<vmem>>, vector<4x256xf32>
    %c4 = arith.constant 4 : index
    %c0_16 = arith.constant 0 : index
    %33 = vector.load %arg9[%c4, %c0_16] : memref<36x256xf32, #tpu.memory_space<vmem>>, vector<4x256xf32>
    tpu.vector_store %arg9[%c4, %c0_16], %32 {strides = array<i32>} : memref<36x256xf32, #tpu.memory_space<vmem>>, vector<4x256xf32>,
    %c0_17 = arith.constant 0 : index
    %c113 = arith.constant 113 : index
    %34 = vector.load %arg8[%c0_17, %c113] : memref<4x512xf32, #tpu.memory_space<vmem>>, vector<4x256xf32>
    %cst_18 = arith.constant 0.000000e+00 : f32
    %35 = vector.broadcast %cst_18 : f32 to vector<4x256xf32>
    %36 = arith.select %27, %34, %35 : vector<4x256xi1>, vector<4x256xf32>
    %c8 = arith.constant 8 : index
    %c0_19 = arith.constant 0 : index
    %37 = vector.load %arg9[%c8, %c0_19] : memref<36x256xf32, #tpu.memory_space<vmem>>, vector<4x256xf32>
    tpu.vector_store %arg9[%c8, %c0_19], %36 {strides = array<i32>} : memref<36x256xf32, #tpu.memory_space<vmem>>, vector<4x256xf32>,
    %c0_20 = arith.constant 0 : index
    %c127 = arith.constant 127 : index
    %38 = vector.load %arg8[%c0_20, %c127] : memref<4x512xf32, #tpu.memory_space<vmem>>, vector<4x256xf32>
    %cst_21 = arith.constant 0.000000e+00 : f32
    %39 = vector.broadcast %cst_21 : f32 to vector<4x256xf32>
    %40 = arith.select %25, %38, %39 : vector<4x256xi1>, vector<4x256xf32>
    %c12 = arith.constant 12 : index
    %c0_22 = arith.constant 0 : index
    %41 = vector.load %arg9[%c12, %c0_22] : memref<36x256xf32, #tpu.memory_space<vmem>>, vector<4x256xf32>
    tpu.vector_store %arg9[%c12, %c0_22], %40 {strides = array<i32>} : memref<36x256xf32, #tpu.memory_space<vmem>>, vector<4x256xf32>,
    %c0_23 = arith.constant 0 : index
    %c128_24 = arith.constant 128 : index
    %42 = vector.load %arg8[%c0_23, %c128_24] : memref<4x512xf32, #tpu.memory_space<vmem>>, vector<4x256xf32>
    %c16 = arith.constant 16 : index
    %c0_25 = arith.constant 0 : index
    %43 = vector.load %arg9[%c16, %c0_25] : memref<36x256xf32, #tpu.memory_space<vmem>>, vector<4x256xf32>
    tpu.vector_store %arg9[%c16, %c0_25], %42 {strides = array<i32>} : memref<36x256xf32, #tpu.memory_space<vmem>>, vector<4x256xf32>,
    %c0_26 = arith.constant 0 : index
    %c129 = arith.constant 129 : index
    %44 = vector.load %arg8[%c0_26, %c129] : memref<4x512xf32, #tpu.memory_space<vmem>>, vector<4x256xf32>
    %cst_27 = arith.constant 0.000000e+00 : f32
    %45 = vector.broadcast %cst_27 : f32 to vector<4x256xf32>
    %46 = arith.select %27, %44, %45 : vector<4x256xi1>, vector<4x256xf32>
    %c20 = arith.constant 20 : index
    %c0_28 = arith.constant 0 : index
    %47 = vector.load %arg9[%c20, %c0_28] : memref<36x256xf32, #tpu.memory_space<vmem>>, vector<4x256xf32>
    tpu.vector_store %arg9[%c20, %c0_28], %46 {strides = array<i32>} : memref<36x256xf32, #tpu.memory_space<vmem>>, vector<4x256xf32>,
    %c0_29 = arith.constant 0 : index
    %c143 = arith.constant 143 : index
    %48 = vector.load %arg8[%c0_29, %c143] : memref<4x512xf32, #tpu.memory_space<vmem>>, vector<4x256xf32>
    %cst_30 = arith.constant 0.000000e+00 : f32
    %49 = vector.broadcast %cst_30 : f32 to vector<4x256xf32>
    %50 = arith.select %25, %48, %49 : vector<4x256xi1>, vector<4x256xf32>
    %c24 = arith.constant 24 : index
    %c0_31 = arith.constant 0 : index
    %51 = vector.load %arg9[%c24, %c0_31] : memref<36x256xf32, #tpu.memory_space<vmem>>, vector<4x256xf32>
    tpu.vector_store %arg9[%c24, %c0_31], %50 {strides = array<i32>} : memref<36x256xf32, #tpu.memory_space<vmem>>, vector<4x256xf32>,
    %c0_32 = arith.constant 0 : index
    %c144 = arith.constant 144 : index
    %52 = vector.load %arg8[%c0_32, %c144] : memref<4x512xf32, #tpu.memory_space<vmem>>, vector<4x256xf32>
    %c28 = arith.constant 28 : index
    %c0_33 = arith.constant 0 : index
    %53 = vector.load %arg9[%c28, %c0_33] : memref<36x256xf32, #tpu.memory_space<vmem>>, vector<4x256xf32>
    tpu.vector_store %arg9[%c28, %c0_33], %52 {strides = array<i32>} : memref<36x256xf32, #tpu.memory_space<vmem>>, vector<4x256xf32>,
    %c0_34 = arith.constant 0 : index
    %c145 = arith.constant 145 : index
    %54 = vector.load %arg8[%c0_34, %c145] : memref<4x512xf32, #tpu.memory_space<vmem>>, vector<4x256xf32>
    %cst_35 = arith.constant 0.000000e+00 : f32
    %55 = vector.broadcast %cst_35 : f32 to vector<4x256xf32>
    %56 = arith.select %27, %54, %55 : vector<4x256xi1>, vector<4x256xf32>
    %c32 = arith.constant 32 : index
    %c0_36 = arith.constant 0 : index
    %57 = vector.load %arg9[%c32, %c0_36] : memref<36x256xf32, #tpu.memory_space<vmem>>, vector<4x256xf32>
    tpu.vector_store %arg9[%c32, %c0_36], %56 {strides = array<i32>} : memref<36x256xf32, #tpu.memory_space<vmem>>, vector<4x256xf32>,
    %c0_37 = arith.constant 0 : index
    %c0_38 = arith.constant 0 : index
    %58 = vector.load %arg2[%c0_37, %c0_38] : memref<32x36xf32, #tpu.memory_space<vmem>>, vector<32x36xf32>
    %c0_39 = arith.constant 0 : index
    %c0_40 = arith.constant 0 : index
    %59 = vector.load %arg9[%c0_39, %c0_40] : memref<36x256xf32, #tpu.memory_space<vmem>>, vector<36x256xf32>
    %cst_41 = arith.constant dense<0.000000e+00> : vector<32x256xf32>
    %60 = tpu.matmul %58, %59, %cst_41 {dimension_numbers = #tpu.dot_dimension_numbers<[1], [0], [0], [1], [0, 0, 1, 1], [], []>} : vector<32x36xf32>, vector<36x256xf32>, vector<32x256xf32> -> vector<32x256xf32>
    %c0_42 = arith.constant 0 : index
    %c0_43 = arith.constant 0 : index
    %61 = vector.load %arg3[%c0_42, %c0_43] : memref<32x1xf32, #tpu.memory_space<vmem>>, vector<32x1xf32>
    %62 = vector.broadcast %61 : vector<32x1xf32> to vector<32x256xf32>
    %63 = arith.addf %60, %62 : vector<32x256xf32>
    %cst_44 = arith.constant 0.000000e+00 : f32
    %64 = vector.broadcast %cst_44 : f32 to vector<32x256xf32>
    %65 = arith.maximumf %63, %64 : vector<32x256xf32>
    %c0_45 = arith.constant 0 : index
    %c0_46 = arith.constant 0 : index
    %c0_47 = arith.constant 0 : index
    %66 = vector.load %arg6[%c0_45, %c0_46, %c0_47] : memref<1x32x256xf32, #tpu.memory_space<vmem>>, vector<1x32x256xf32>
    %67 = vector.shape_cast %66 : vector<1x32x256xf32> to vector<32x256xf32>
    %68 = vector.shape_cast %65 : vector<32x256xf32> to vector<1x32x256xf32>
    tpu.vector_store %arg6[%c0_45, %c0_46, %c0_47], %68 {strides = array<i32>} : memref<1x32x256xf32, #tpu.memory_space<vmem>>, vector<1x32x256xf32>,
    %c0_48 = arith.constant 0 : index
    %c0_49 = arith.constant 0 : index
    %69 = vector.load %arg4[%c0_48, %c0_49] : memref<8x32xf32, #tpu.memory_space<vmem>>, vector<8x32xf32>
    %cst_50 = arith.constant dense<0.000000e+00> : vector<8x256xf32>
    %70 = tpu.matmul %69, %65, %cst_50 {dimension_numbers = #tpu.dot_dimension_numbers<[1], [0], [0], [1], [0, 0, 1, 1], [], []>} : vector<8x32xf32>, vector<32x256xf32>, vector<8x256xf32> -> vector<8x256xf32>
    %cst_51 = arith.constant dense<0.000000e+00> : vector<8xf32>
    %71 = vector.multi_reduction <add>, %70, %cst_51 [1] : vector<8x256xf32> to vector<8xf32>
    %72 = vector.shape_cast %71 : vector<8xf32> to vector<8x1xf32>
    %cst_52 = arith.constant 3.906250e-03 : f32
    %73 = vector.broadcast %cst_52 : f32 to vector<8x1xf32>
    %74 = arith.mulf %72, %73 : vector<8x1xf32>
    %c0_53 = arith.constant 0 : index
    %c0_54 = arith.constant 0 : index
    %75 = vector.load %arg5[%c0_53, %c0_54] : memref<8x1xf32, #tpu.memory_space<vmem>>, vector<8x1xf32>
    %76 = arith.addf %74, %75 : vector<8x1xf32>
    %c0_55 = arith.constant 0 : index
    %c0_56 = arith.constant 0 : index
    %c0_57 = arith.constant 0 : index
    %77 = vector.load %arg7[%c0_55, %c0_56, %c0_57] : memref<1x8x1xf32, #tpu.memory_space<vmem>>, vector<1x8x1xf32>
    %78 = vector.shape_cast %77 : vector<1x8x1xf32> to vector<8x1xf32>
    %79 = vector.shape_cast %76 : vector<8x1xf32> to vector<1x8x1xf32>
    tpu.vector_store %arg7[%c0_55, %c0_56, %c0_57], %79 {strides = array<i32>} : memref<1x8x1xf32, #tpu.memory_space<vmem>>, vector<1x8x1xf32>,
    return
  }
  func.func @transform_0(%arg0: i32) -> (i32, i32, i32) {
    %c0_i32 = arith.constant 0 : i32
    %c0_i32_0 = arith.constant 0 : i32
    %c0_i32_1 = arith.constant 0 : i32
    return %arg0, %c0_i32, %c0_i32_0 : i32, i32, i32
  }
  func.func @transform_1(%arg0: i32) -> (i32, i32) {
    %c0_i32 = arith.constant 0 : i32
    %c0_i32_0 = arith.constant 0 : i32
    %c0_i32_1 = arith.constant 0 : i32
    return %c0_i32, %c0_i32_0 : i32, i32
  }
  func.func @transform_2(%arg0: i32) -> (i32, i32) {
    %c0_i32 = arith.constant 0 : i32
    %c0_i32_0 = arith.constant 0 : i32
    %c0_i32_1 = arith.constant 0 : i32
    return %c0_i32, %c0_i32_0 : i32, i32
  }
  func.func @transform_3(%arg0: i32) -> (i32, i32) {
    %c0_i32 = arith.constant 0 : i32
    %c0_i32_0 = arith.constant 0 : i32
    %c0_i32_1 = arith.constant 0 : i32
    return %c0_i32, %c0_i32_0 : i32, i32
  }
  func.func @transform_4(%arg0: i32) -> (i32, i32) {
    %c0_i32 = arith.constant 0 : i32
    %c0_i32_0 = arith.constant 0 : i32
    %c0_i32_1 = arith.constant 0 : i32
    return %c0_i32, %c0_i32_0 : i32, i32
  }
  func.func @transform_5(%arg0: i32) -> (i32, i32, i32) {
    %c0_i32 = arith.constant 0 : i32
    %c0_i32_0 = arith.constant 0 : i32
    %c0_i32_1 = arith.constant 0 : i32
    return %arg0, %c0_i32, %c0_i32_0 : i32, i32, i32
  }
  func.func @transform_6(%arg0: i32) -> (i32, i32, i32) {
    %c0_i32 = arith.constant 0 : i32
    %c0_i32_0 = arith.constant 0 : i32
    %c0_i32_1 = arith.constant 0 : i32
    return %arg0, %c0_i32, %c0_i32_0 : i32, i32, i32
  }
}

</mosaic_0001>

<bundles_post_ra>
// kernel: tpu_custom_call.1
= control target key start
LH: loop header
LB: loop body
LE: loop exit
PB: predicated region body
PF: predicated region fallthrough
CT: control target
= control target key end

     0   :  { %12 = vsyncpa [#allocation5], 0  ;;  %s1341_s0 = inlined_call_operand.hbm [shape: f32[2,4,256], index: 0, kind: input, shape index: {}]   ;;  %s1342_s1 = inlined_call_operand.vmem [shape: f32[32,36], index: 1, kind: input, shape index: {}]   ;;  %s1343_s2 = inlined_call_operand.vmem [shape: f32[32,1], index: 2, kind: input, shape index: {}]   ;;  %s1344_s3 = inlined_call_operand.vmem [shape: f32[8,32], index: 3, kind: input, shape index: {}]   ;;  %s1345_s4 = inlined_call_operand.vmem [shape: f32[8,1], index: 4, kind: input, shape index: {}]   ;;  %s1346_s5 = inlined_call_operand.hbm [shape: f32[2,32,256], index: 5, kind: output, shape index: {0}]   ;;  %s1347_s6 = inlined_call_operand.vmem [shape: f32[2,8,1], index: 6, kind: output, shape index: {1}]  }
   0x1   :  { %14 = vsyncpa [#allocation5 + $0x1], 0 }
   0x2   :  { %15 = vsyncpa [#allocation6], 0 }
   0x3   :  { %17 = vsyncpa [#allocation6 + $0x1], 0  ;;  %s1085_s21 = smov 0   ;;  %s1087_s22 = smov 0  }
   0x4   :  { %s1089_s23 = smov 0   ;;  %s1091_s24 = smov 0  }
   0x5 LB: > { %s1106_s25 = sadd.s32 4294967295, %s1035_s24   ;;  %s854_s26 = sadd.s32 4294967294, %s1035_s24   ;;  %s1035_s24 = sphi %s1091_s24, %s1372_s24   ;;  %s1031_s23 = sphi %s1089_s23, %s1371_s23   ;;  %s1027_s22 = sphi %s1087_s22, %s1370_s22   ;;  %s1023_s21 = sphi %s1085_s21, %s1369_s21  }
   0x6   : > { %s1110_s27 = sadd.s32 1, %s1035_s24   ;;  %s30_s28 = sadd.s32 1, %s1031_s23 }
   0x7   : > { %s27_s29 = ssub.s32 %s1035_s24, %s1110_s27  ;;  %p37_p0 = scmp.ne.s32.totalorder %s1031_s23, %s1027_s22 }
   0x8   : > { %p28_p1 = scmp.eq.s32.totalorder %s27_s29, 0  ;;  %p38_p2 = scmp.eq.s32.totalorder %s1035_s24, 0 }
   0x9   : > { %p43_p3 = scmp.ne.s32.totalorder %s1027_s22, %s1023_s21  ;;  %p44_p4 = scmp.eq.s32.totalorder %s1106_s25, 0 }
   0xa   : > { %s1122_s30 = scalar_select %p28_p1, %s1031_s23, %s30_s28  }
   0xb   : > { %p1124_p5 = por %p38_p2, %p37_p0  ;;  %p1128_p6 = por %p44_p4, %p43_p3 }
   0xc   : > { %p151_p7 = scmp.eq.s32.totalorder %s1106_s25, 1  ;;  %p157_p8 = scmp.eq.s32.totalorder %s854_s26, 1 }
   0xd   : > { %s1351_s8 = scalar_select %p1128_p6, 1, 0 }
   0xe   : > { %p890_p10 = scmp.lt.s32.totalorder %s1035_s24, 2  ;;  %p1135_p11 = por %p151_p7, %p37_p0 }
   0xf   : > { %p1139_p12 = por %p157_p8, %p43_p3  ;;  %s215_s11 = sand.u32 1, %s1031_s23  }
  0x10   : > { %s1352_s9 = scalar_select %p1135_p11, 1, 0 }
  0x11   : > { %s1353_s10 = scalar_select %p1139_p12, 1, 0 }
  0x12   : > { %s876_s12 = sshll.u32 %s1035_s24, 7  ;;  %s857_s13 = sshll.u32 %s215_s11, 3 }
  0x13   : > { %s1148_s16 = scalar_lea.hbm %s1341_s0, %s876_s12  ;;  %s219_s17 = scalar_lea.vmem [#allocation4], %s857_s13 }
  0x14   : > { %s227_s18 = sshll.u32 %s219_s17, 4  ;;  %p1152_p13 = pnand %p890_p10, %p1124_p5  ;;  %s1156_s18 = int_to_ptr.vmem [resolvable:$true] %s227_s18 }
  0x15   : > { %s216_s20 = scalar_lea.sflag [#allocation5], %s215_s11  ;;  %s943_s26 = scalar_lea.hbm %s1148_s16, 128 }
  0x16   : > { %p944_p2 = scmp.ne.s32.totalorder %s1148_s16, %s943_s26  ;;  %p945_p3 = pneg %p1152_p13 }
  0x17   : > { %s948_s7 = scalar_lea.hbm %s1341_s0, 256  ;;  %p949_p5 = scmp.lt.s32.totalorder %s1148_s16, %s1341_s0 }
  0x18   : > { %p946_p4 = pnand %p945_p3, %p944_p2  ;;  %p950_p8 = scmp.lt.s32.totalorder %s948_s7, %s943_s26 }
  0x1a   : > { %p947_p7 = pneg %p946_p4  ;;  %p951_p10 = por %p950_p8, %p949_p5 }
  0x1c   : > { %p952_p9 = pnand %p951_p10, %p947_p7 }
  0x1e   : > { %955 = shalt.err (!%p952_p9)
}
  0x1f   : > { %s956_s11 = scalar_lea.vmem %s1156_s18, 128  ;;  %s1037_s14 = smov [#allocation4]  }
  0x20   : > { %p957_p0 = scmp.ne.s32.totalorder %s1156_s18, %s956_s11  ;;  %s961_s15 = sshll.u32 %s1037_s14, 4  ;;  %s962_s15 = int_to_ptr.vmem [resolvable:$false] %s961_s15 }
  0x21   : > { %s963_s17 = scalar_lea.vmem %s962_s15, 256  ;;  %p964_p4 = scmp.lt.s32.totalorder %s1156_s18, %s962_s15 }
  0x22   : > { %p959_p1 = pnand %p957_p0, %p945_p3  ;;  %p965_p12 = scmp.lt.s32.totalorder %s963_s17, %s956_s11 }
  0x24   : > { %p960_p2 = pneg %p959_p1  ;;  %p966_p11 = por %p965_p12, %p964_p4 }
  0x26   : > { %p967_p6 = pnand %p966_p11, %p960_p2 }
  0x28   : > { %970 = shalt.err (!%p967_p6)
}
  0x29   : > { %885 = dma.hbm_to_vmem [thread:$0]  (!%p1152_p13), %s1148_s16, 128, %s1156_s18, %s216_s20  }
  0x2a   : > { %p1355_p9 = scmp.lt.s32.totalorder %s1035_s24, 3  ;;  %p1356_p7 = scmp.ge.s32.totalorder %s1035_s24, 1 }
  0x2c   : > { %p233_p0 = pnand %p1356_p7, %p1355_p9 }
  0x2d   : > { %s1183_s26 = sand.u32 (!%p233_p0), 1, %s1027_s22   ;;  %p1357_p6 = scmp.ne.s32.totalorder (!%p233_p0), %s1351_s8, 0 }
  0x2e   : > { %236 = sbr.rel (%p233_p0) target bundleno = 790 (0x316), region = 40  ;;  %s861_s28 = sshll.u32 (!%p233_p0), %s1183_s26, 3 }
  0x2f   : > { %s239_s29 = scalar_lea.sflag (!%p233_p0), [#allocation5], %s1183_s26  ;;  %s242_s7 = scalar_lea.vmem (!%p233_p0), [#allocation4], %s861_s28 }
  0x33   : > { %1014 = dma.done.wait (%p1357_p6), %s239_s29, 128  }
  0x34   : > { %1016 = vsyncadd (%p1357_p6), %s239_s29, 4294967168  ;;  %v1038_v0 = vmov 0.0   ;;  %v280_v1 = vld [vmem:[%s242_s7] sm:$0xff]  ;;  %s1039_s16 = smov 111   ;;  %s1040_s8 = smov 127   ;;  %v507_v15 = vld [vmem:[%s1343_s2 + $0x18] sm:$0xff]  ;;  %v283_v20 = vlaneseq }
  0x35   : > { %282 = vst [vmem:[#allocation2 + $0xc] sm:$0xf] %v1038_v0  ;;  %279 = vst [vmem:[#allocation2] sm:$0xf] %v1038_v0  ;;  %612 = vmatprep.mubr.f32.mxu0 %v1038_v0  ;;  %722 = vmatprep.mubr.f32.mxu1 %v1038_v0  ;;  %v474_v3 = vcombine.high %v280_v1, %v280_v1  ;;  %s1041_s18 = smov 112   ;;  %s1042_s19 = smov 113   ;;  %v455_v9 = vcombine.low %v280_v1, %v280_v1 }
  0x36   : > { %281 = vst [vmem:[#allocation2 + $0x4] sm:$0xff] %v280_v1  ;;  %475 = vrot.lane.b32.xlu1 %v280_v1, %s1039_s16  ;;  %403 = vst [vmem:[#allocation3 + $0x48] sm:$0xf] %v280_v1  ;;  %s1043_s20 = smov 1   ;;  %s1044_s12 = smov 15   ;;  %v506_v16 = vld [vmem:[%s1343_s2 + $0x10] sm:$0xff] }
  0x37   : > { %404 = vst [vmem:[#allocation3 + $0x28] sm:$0xf] %v474_v3  ;;  %s1045_s13 = smov 17   ;;  %s1046_s11 = smov 16   ;;  %v1047_v17 = vmov 0   ;;  %v504_v18 = vld [vmem:[%s1343_s2] sm:$0xff] }
  0x38   : > { %935 = vset.pattern.permute.xlu0 %v1047_v17  ;;  %936 = vset.pattern.permute.xlu1 %v1047_v17  ;;  %v505_v19 = vld [vmem:[%s1343_s2 + $0x8] sm:$0xff]  ;;  %v284_v21 = vand.u32 127, %v283_v20  ;;  %vm416_vm0 = vcmask 1039360   ;;  %vm481_vm3 = vcmask 908288   ;;  %vm442_vm4 = vcmask 924672   ;;  %v490_v31 = vld [vmem:[%s1342_s1] sm:$0xff] }
  0x39   : > { %vm463_vm7 = vcmask 916480   ;;  %vm384_vm8 = vcmask 7168   ;;  %vm541_vm9 = vcmask 1043456   ;;  %vm364_vm10 = vcmask 121856   ;;  %s862_s28 = sshll.u32 %s1183_s26, 6  ;;  %p1366_p12 = scmp.ne.s32.totalorder %s1352_s9, 0 }
  0x3a   : > { %410 = vrot.lane.b32.xlu1 %v280_v1, %s1040_s8  ;;  %v285_v24 = vadd.s32 128, %v284_v21  ;;  %v290_v27 = vand.u32 15, %v284_v21  ;;  %vm325_vm11 = vcmask 138240   ;;  %vm346_vm12 = vcmask 130048   ;;  %s1268_s29 = scalar_lea.vmem [#allocation7], %s862_s28  ;;  %s1048_s15 = smov [#allocation7]  }
  0x3b   : > { %vm528_vm13 = vcmask 293888   ;;  %vm654_vm14 = vcmask 261120   ;;  %s975_s17 = sshll.u32 %s1048_s15, 4  ;;  %s976_s17 = int_to_ptr.vmem [resolvable:$false] %s975_s17 }
  0x3c   : > { %v471_v2 = vld [vmem:[#allocation2 + $0xc] sm:$0xf]  ;;  %v297_v28 = vand.u32 15, %v285_v24  ;;  %vm1210_vm1 = vcmp.le.s32.totalorder %v290_v27, 14  ;;  %vm1222_vm5 = vcmp.ge.s32.totalorder %v290_v27, 1  ;;  %s977_s28 = scalar_lea.vmem %s976_s17, 2048 }
  0x3d   : > { %479 = vrot.lane.b32.xlu0 %v471_v2, %s1039_s16  ;;  %v406_v4 = vld [vmem:[#allocation2 + $0xc] sm:$0xf]  ;;  %v373_v6 = vld [vmem:[#allocation2] sm:$0xff]  ;;  %v374_v10 = vld [vmem:[#allocation2 + $0x8] sm:$0xf] }
  0x3e   : > { %v432_v5 = vld [vmem:[#allocation2 + $0xc] sm:$0xf]  ;;  %459 = vrot.lane.b32.xlu1 %v280_v1, %s1041_s18  ;;  %v377_v7 = vcombine.high %v373_v6, %v373_v6  ;;  %v354_v11 = vld [vmem:[#allocation2 + $0x8] sm:$0xf]  ;;  %v338_v13 = vcombine.low %v373_v6, %v373_v6  ;;  %vm1214_vm2 = vcmp.le.s32.totalorder %v297_v28, 14  ;;  %vm1226_vm6 = vcmp.ge.s32.totalorder %v297_v28, 1 }
  0x3f   : > { %v939_v8 = vld [vmem:[#allocation2 + $0xc] ss:$0 sps:$4 sm:$0xff]   ;;  %v315_v12 = vld [vmem:[#allocation2 + $0x8] sm:$0xf] }
  0x40   : > { %v942_v14 = vld [vmem:[#allocation2 + $0x8] ss:$0 sps:$4 sm:$0xff]  }
  0x41   : > { %414 = vrot.lane.b32.xlu0 %v406_v4, %s1040_s8 }
  0x42   : > { %412 = vrot.lane.b32.xlu1 %v474_v3, %s1040_s8  ;;  %s754_s8 = sshll.u32 %s1268_s29, 4  ;;  %s1282_s8 = int_to_ptr.vmem [resolvable:$true] %s754_s8 }
  0x43   : > { %s971_s14 = scalar_lea.vmem %s1282_s8, 1024  ;;  %p978_p3 = scmp.lt.s32.totalorder %s1282_s8, %s976_s17 }
  0x44   : > { %p972_p11 = scmp.ne.s32.totalorder %s1282_s8, %s971_s14  ;;  %p979_p5 = scmp.lt.s32.totalorder %s977_s28, %s971_s14 }
  0x45   : > { %440 = vrot.lane.b32.xlu0 %v432_v5, %s1042_s19 }
  0x46   : > { %438 = vrot.lane.b32.xlu1 %v474_v3, %s1042_s19  ;;  %p973_p13 = pnand %p972_p11, %p1366_p12  ;;  %p980_p8 = por %p979_p5, %p978_p3 }
  0x48   : > { %p974_p1 = pneg %p973_p13 }
  0x49   : > { %436 = vrot.lane.b32.xlu0 %v280_v1, %s1042_s19 }
  0x4a   : > { %380 = vrot.lane.b32.xlu1 %v377_v7, %s1043_s20  ;;  %p981_p10 = pnand %p980_p8, %p974_p1 }
  0x4d   : > { %477 = vrot.lane.b32.xlu0 %v474_v3, %s1039_s16 }
  0x4e   : > { %457 = vrot.lane.b32.xlu1 %v455_v9, %s1041_s18 }
  0x51   : > { %461 = vrot.lane.b32.xlu0 %v939_v8, %s1041_s18  ;;  %s877_s18 = sshll.u32 %s1106_s25, 10 }
  0x52   : > { %360 = vrot.lane.b32.xlu1 %v377_v7, %s1044_s12 }
  0x55   : > { %382 = vrot.lane.b32.xlu0 %v374_v10, %s1043_s20 }
  0x56   : > { %358 = vrot.lane.b32.xlu1 %v373_v6, %s1044_s12 }
  0x59   : > { %378 = vrot.lane.b32.xlu0 %v373_v6, %s1043_s20 }
  0x5a   : > { %323 = vrot.lane.b32.xlu1 %v315_v12, %s1045_s13 }
  0x5d   : > { %362 = vrot.lane.b32.xlu0 %v354_v11, %s1044_s12  ;;  %s1288_s12 = scalar_lea.hbm %s1346_s5, %s877_s18 }
  0x5e   : > { %342 = vrot.lane.b32.xlu1 %v373_v6, %s1046_s11 }
  0x61   : > { %321 = vrot.lane.b32.xlu0 %v377_v7, %s1045_s13 }
  0x62   : > { %340 = vrot.lane.b32.xlu1 %v338_v13, %s1046_s11 }
  0x65   : > { %319 = vrot.lane.b32.xlu0 %v373_v6, %s1045_s13  ;;  %s737_s13 = scalar_lea.sflag [#allocation6], %s1183_s26 }
  0x66   : > { %520 = vperm.xlu1 %936, %v506_v16  }
  0x69   : > { %344 = vrot.lane.b32.xlu0 %v942_v14, %s1046_s11 }
  0x6a   : > { %515 = vperm.xlu1 %936, %v505_v19  }
  0x6d   : > { %525 = vperm.xlu0 %935, %v507_v15  }
  0x71   : > { %510 = vperm.xlu0 %935, %v504_v18  }
  0xa8   : > { %v476_v22 = vpop.permute.xlu1 %475 }
  0xac   : > { %v411_v25 = vpop.permute.xlu1 %410 }
  0xaf   : > { %v480_v23 = vpop.permute.xlu0 %479 }
  0xb0   : > { %v460_v29 = vpop.permute.xlu1 %459 }
  0xb3   : > { %v415_v26 = vpop.permute.xlu0 %414 }
  0xb4   : > { %v413_v33 = vpop.permute.xlu1 %412 }
  0xb5   : > { %v417_v35 = vsel %vm416_vm0, %v411_v25, %v413_v33  ;;  %v418_v36 = vsel %vm416_vm0, %v413_v33, %v415_v26  ;;  %v491_v33 = vld [vmem:[%s1342_s1 + $0x8] sm:$0xff] }
  0xb6   : > { %v421_v37 = vsel %vm1210_vm1, %v417_v35, 0.0  ;;  %v422_v38 = vsel %vm1214_vm2, %v418_v36, 0.0  ;;  %v493_v35 = vld [vmem:[%s1342_s1 + $0x18] sm:$0xff] }
  0xb7   : > { %v441_v30 = vpop.permute.xlu0 %440  ;;  %v425_v39 = vrot.slane %v421_v37, 4  ;;  %v426_v40 = vrot.slane %v422_v38, 4 }
  0xb8   : > { %v439_v43 = vpop.permute.xlu1 %438 }
  0xb9   : > { %429 = vst [vmem:[#allocation3 + $0x48] sm:$0xf0] %v425_v39  ;;  %430 = vst [vmem:[#allocation3 + $0x28] sm:$0xf0] %v426_v40  ;;  %v444_v46 = vsel %vm442_vm4, %v439_v43, %v441_v30 }
  0xba   : > { %v448_v50 = vsel %vm1226_vm6, %v444_v46, 0.0 }
  0xbb   : > { %v437_v34 = vpop.permute.xlu0 %436  ;;  %450 = vst [vmem:[#allocation3 + $0x20] sm:$0xf] %v448_v50 }
  0xbc   : > { %v443_v45 = vsel %vm442_vm4, %v437_v34, %v439_v43  ;;  %v381_v53 = vpop.permute.xlu1 %380  ;;  %v492_v34 = vld [vmem:[%s1342_s1 + $0x10] sm:$0xff] }
  0xbd   : > { %v447_v49 = vsel %vm1222_vm5, %v443_v45, 0.0 }
  0xbe   : > { %449 = vst [vmem:[#allocation3 + $0x8] sm:$0xf] %v447_v49 }
  0xbf   : > { %v478_v44 = vpop.permute.xlu0 %477 }
  0xc0   : > { %v482_v47 = vsel %vm481_vm3, %v476_v22, %v478_v44  ;;  %v483_v48 = vsel %vm481_vm3, %v478_v44, %v480_v23  ;;  %v458_v56 = vpop.permute.xlu1 %457  ;;  %v499_v13 = vld [vmem:[#allocation3 + $0x28] sm:$0xff] }
  0xc1   : > { %v486_v51 = vsel %vm1210_vm1, %v482_v47, 0.0  ;;  %v487_v52 = vsel %vm1214_vm2, %v483_v48, 0.0  ;;  %v464_v58 = vsel %vm463_vm7, %v458_v56, %v460_v29  ;;  %v498_v15 = vld [vmem:[#allocation3 + $0x48] sm:$0xff] }
  0xc2   : > { %488 = vst [vmem:[#allocation3 + $0x40] sm:$0xf] %v486_v51  ;;  %489 = vst [vmem:[#allocation3 + $0x38] sm:$0xf] %v487_v52 }
  0xc3   : > { %v462_v54 = vpop.permute.xlu0 %461  ;;  %468 = vst [vmem:[#allocation3 + $0x8] sm:$0xf0] %v464_v58 }
  0xc4   : > { %v465_v55 = vsel %vm463_vm7, %v460_v29, %v462_v54  ;;  %v361_v1 = vpop.permute.xlu1 %360 }
  0xc5   : > { %469 = vst [vmem:[#allocation3 + $0x20] sm:$0xf0] %v465_v55 }
  0xc7   : > { %v383_v57 = vpop.permute.xlu0 %382 }
  0xc8   : > { %v386_v59 = vsel %vm384_vm8, %v381_v53, %v383_v57  ;;  %v359_v7 = vpop.permute.xlu1 %358 }
  0xc9   : > { %v503_v60 = vld [vmem:[#allocation3 + $0x38] sm:$0xf]  ;;  %v390_v61 = vsel %vm1226_vm6, %v386_v59, 0.0  ;;  %v502_v62 = vld [vmem:[#allocation3 + $0x40] sm:$0xf]  ;;  %v365_v9 = vsel %vm364_vm10, %v359_v7, %v361_v1 }
  0xca   : > { %864 = vmatprep.subr.msk.mxu0 %vm541_vm9, %v503_v60  ;;  %v394_v63 = vrot.slane %v390_v61, 4  ;;  %v500_v10 = vld [vmem:[#allocation3 + $0x8] sm:$0xff]  ;;  %v369_v12 = vsel %vm1210_vm1, %v365_v9, 0.0 }
  0xcb   : > { %865 = vmatpush1.msk.msra.mxu0 %vm541_vm9, %v502_v62  ;;  %v379_v2 = vpop.permute.xlu0 %378  ;;  %371 = vst [vmem:[#allocation3 + $0x18] sm:$0xf] %v369_v12 }
  0xcc   : > { %398 = vst [vmem:[#allocation3 + $0x10] sm:$0xf0] %v394_v63  ;;  %v385_v3 = vsel %vm384_vm8, %v379_v2, %v381_v53  ;;  %v501_v4 = vld [vmem:[#allocation3 + $0x20] sm:$0xff]  ;;  %v324_v16 = vpop.permute.xlu1 %323  ;;  %v653_v63 = vld [vmem:[%s1344_s3] sm:$0xff] }
  0xcd   : > { %v389_v5 = vsel %vm1222_vm5, %v385_v3, 0.0  ;;  %572 = vmatprep.subr.mxu0 %v501_v4 }
  0xce   : > { %v393_v6 = vrot.slane %v389_v5, 4  ;;  %573 = vmatpush1.msra.mxu0 %v500_v10 }
  0xcf   : > { %v363_v8 = vpop.permute.xlu0 %362  ;;  %574 = vmatprep.subr.mxu0 %v499_v13 }
  0xd0   : > { %397 = vst [vmem:[#allocation3 + $0x18] sm:$0xf0] %v393_v6  ;;  %v366_v11 = vsel %vm364_vm10, %v361_v1, %v363_v8  ;;  %575 = vmatpush1.msra.mxu0 %v498_v15  ;;  %v343_v20 = vpop.permute.xlu1 %342 }
  0xd1   : > { %v370_v14 = vsel %vm1214_vm2, %v366_v11, 0.0 }
  0xd2   : > { %372 = vst [vmem:[#allocation3 + $0x10] sm:$0xf] %v370_v14 }
  0xd3   : > { %v322_v17 = vpop.permute.xlu0 %321 }
  0xd4   : > { %v327_v18 = vsel %vm325_vm11, %v322_v17, %v324_v16  ;;  %v341_v26 = vpop.permute.xlu1 %340 }
  0xd5   : > { %v331_v19 = vsel %vm1226_vm6, %v327_v18, 0.0  ;;  %v347_v28 = vsel %vm346_vm12, %v341_v26, %v343_v20 }
  0xd6   : > { %333 = vst [vmem:[#allocation3] sm:$0xf] %v331_v19  ;;  %351 = vst [vmem:[#allocation3 + $0x30] sm:$0xf0] %v347_v28 }
  0xd7   : > { %v320_v21 = vpop.permute.xlu0 %319  ;;  %v496_v25 = vld [vmem:[#allocation3 + $0x18] sm:$0xff] }
  0xd8   : > { %v326_v22 = vsel %vm325_vm11, %v320_v21, %v322_v17 }
  0xd9   : > { %v330_v23 = vsel %vm1222_vm5, %v326_v22, 0.0  ;;  %v497_v24 = vld [vmem:[#allocation3 + $0x10] sm:$0xff] }
  0xda   : > { %332 = vst [vmem:[#allocation3 + $0x30] sm:$0xf] %v330_v23  ;;  %576 = vmatprep.subr.mxu0 %v497_v24 }
  0xdb   : > { %v345_v27 = vpop.permute.xlu0 %344  ;;  %577 = vmatpush1.msra.mxu0 %v496_v25 }
  0xdc   : > { %v348_v29 = vsel %vm346_vm12, %v343_v20, %v345_v27 }
  0xdd   : > { %352 = vst [vmem:[#allocation3] sm:$0xf0] %v348_v29 }
  0xe1   : > { %v494_v32 = vld [vmem:[#allocation3 + $0x30] sm:$0xff]  ;;  %v521_v37 = vpop.permute.xlu1 %520 }
  0xe4   : > { %v495_v30 = vld [vmem:[#allocation3] sm:$0xff] }
  0xe5   : > { %578 = vmatprep.subr.mxu0 %v495_v30  ;;  %v516_v42 = vpop.permute.xlu1 %515 }
  0xe6   : > { %579 = vmatpush1.msra.mxu0 %v494_v32 }
  0xe7   : > { %866 = vmatmul.mubr.msk.f32.vlgmr.msra.gmra.mxu0 %vm528_vm13, %v490_v31 }
  0xe8   : > { %618 = vmatprep.mubr.f32.mxu0 %v1038_v0  ;;  %v526_v36 = vpop.permute.xlu0 %525 }
  0xeb   : > { %867 = vmatmul.mubr.msk.f32.gmra.mxu0 %vm528_vm13, %v491_v33 }
  0xec   : > { %624 = vmatprep.mubr.f32.mxu0 %v1038_v0  ;;  %v511_v38 = vpop.permute.xlu0 %510 }
  0xef   : > { %868 = vmatmul.mubr.msk.f32.gmra.mxu0 %vm528_vm13, %v492_v34 }
  0xf0   : > { %630 = vmatprep.mubr.f32.mxu0 %v1038_v0 }
  0xf3   : > { %869 = vmatmul.mubr.msk.f32.gmra.mxu0 %vm528_vm13, %v493_v35 }
 0x1a7   : > { %v614_v39 = vpop.f32.mrf.mxu0 }
 0x1a8   : > { %v615_v40 = vadd.f32 %v614_v39, %v511_v38 }
 0x1a9   : > { %v616_v41 = vpop.f32.mrf.mxu0 }
 0x1aa   : > { %v637_v43 = vmax.f32 %v615_v40, 0.0  ;;  %v617_v44 = vadd.f32 %v616_v41, %v511_v38 }
 0x1ab   : > { %v620_v45 = vpop.f32.mrf.mxu0 }
 0x1ac   : > { %645 = vst [vmem:[%s1268_s29] sm:$0xff] %v637_v43  ;;  %v638_v0 = vmax.f32 %v617_v44, 0.0  ;;  %v621_v46 = vadd.f32 %v620_v45, %v516_v42 }
 0x1ad   : > { %v622_v47 = vpop.f32.mrf.mxu0 }
 0x1ae   : > { %646 = vst [vmem:[%s1268_s29 + $0x8] sm:$0xff] %v638_v0  ;;  %v639_v48 = vmax.f32 %v621_v46, 0.0  ;;  %v623_v49 = vadd.f32 %v622_v47, %v516_v42 }
 0x1af   : > { %v626_v50 = vpop.f32.mrf.mxu0 }
 0x1b0   : > { %647 = vst [vmem:[%s1268_s29 + $0x10] sm:$0xff] %v639_v48  ;;  %v640_v51 = vmax.f32 %v623_v49, 0.0  ;;  %v627_v52 = vadd.f32 %v626_v50, %v521_v37 }
 0x1b1   : > { %v628_v53 = vpop.f32.mrf.mxu0 }
 0x1b2   : > { %648 = vst [vmem:[%s1268_s29 + $0x18] sm:$0xff] %v640_v51  ;;  %v641_v54 = vmax.f32 %v627_v52, 0.0  ;;  %v629_v55 = vadd.f32 %v628_v53, %v521_v37 }
 0x1b3   : > { %v632_v56 = vpop.f32.mrf.mxu0 }
 0x1b4   : > { %649 = vst [vmem:[%s1268_s29 + $0x20] sm:$0xff] %v641_v54  ;;  %v642_v57 = vmax.f32 %v629_v55, 0.0  ;;  %v633_v58 = vadd.f32 %v632_v56, %v526_v36 }
 0x1b5   : > { %v634_v59 = vpop.f32.mrf.mxu0 }
 0x1b6   : > { %650 = vst [vmem:[%s1268_s29 + $0x28] sm:$0xff] %v642_v57  ;;  %v643_v60 = vmax.f32 %v633_v58, 0.0  ;;  %v635_v61 = vadd.f32 %v634_v59, %v526_v36 }
 0x1b8   : > { %651 = vst [vmem:[%s1268_s29 + $0x30] sm:$0xff] %v643_v60  ;;  %v644_v62 = vmax.f32 %v635_v61, 0.0 }
 0x1ba   : > { %652 = vst [vmem:[%s1268_s29 + $0x38] sm:$0xff] %v644_v62  ;;  %682 = vmatprep.subr.mxu1 %v644_v62 }
 0x1bb   : > { %683 = vmatpush1.msra.mxu1 %v643_v60 }
 0x1bc   : > { %684 = vmatprep.subr.mxu1 %v642_v57 }
 0x1bd   : > { %685 = vmatpush1.msra.mxu1 %v641_v54 }
 0x1be   : > { %686 = vmatprep.subr.mxu1 %v640_v51 }
 0x1bf   : > { %687 = vmatpush1.msra.mxu1 %v639_v48 }
 0x1c0   : > { %688 = vmatprep.subr.mxu1 %v638_v0 }
 0x1c1   : > { %689 = vmatpush1.msra.mxu1 %v637_v43 }
 0x1c2   : > { %870 = vmatmul.mubr.msk.f32.vlgmr.msra.gmra.mxu1 %vm654_vm14, %v653_v63 }
 0x282   : > { %v724_v1 = vpop.f32.mrf.mxu1 }
 0x284   : > { %v726_v2 = vpop.f32.mrf.mxu1 }
 0x285   : > { %v729_v3 = vadd.f32 %v726_v2, %v724_v1 }
 0x287   : > { %730 = vadd.xlane.f32.xlu1 %v729_v3 }
 0x288   : > { %984 = shalt.err (!%p981_p10)
}
 0x289   : > { %s985_s29 = scalar_lea.hbm %s1288_s12, 1024  ;;  %s989_s18 = scalar_lea.hbm %s1346_s5, 2048 }
 0x28a   : > { %p986_p2 = scmp.ne.s32.totalorder %s1288_s12, %s985_s29  ;;  %p990_p7 = scmp.lt.s32.totalorder %s1288_s12, %s1346_s5 }
 0x28b   : > { %p991_p0 = scmp.lt.s32.totalorder %s989_s18, %s985_s29 }
 0x28c   : > { %p987_p4 = pnand %p986_p2, %p1366_p12 }
 0x28d   : > { %p992_p6 = por %p991_p0, %p990_p7 }
 0x28e   : > { %p988_p9 = pneg %p987_p4 }
 0x290   : > { %p993_p11 = pnand %p992_p6, %p988_p9 }
 0x292   : > { %996 = shalt.err (!%p993_p11)
}
 0x293   : > { %s1049_s14 = smov 256   ;;  %p275_p13 = scmp.lt.s32.totalorder %s1106_s25, 1  ;;  %v733_v4 = vld [vmem:[%s1345_s4] sm:$0xff] }
 0x294   : > { %880 = dma.vmem_to_hbm [thread:$0]  (%p1366_p12), %s1282_s8, 1024, %s1288_s12, %s737_s13, %s1049_s14, %s1049_s14, %s1046_s11  }
 0x295   : > { %s1374_s25 = smov (!%p275_p13, %s1106_s25), 1 }
 0x296   : > { %s863_s15 = sshll.u32 %s1374_s25, 3 }
 0x297   : > { %s278_s9 = scalar_lea.vmem %s1347_s6, %s863_s15 }
 0x310   : > { %v731_v5 = vpop.xlane.xlu1 %730 }
 0x311   : > { %v732_v6 = vmul.f32 0.00390625, %v731_v5 }
 0x313   : > { %v734_v7 = vadd.f32 %v733_v4, %v732_v6 }
 0x315   : > { %735 = vst.msk [vmem:[%s278_s9] sm:$0xff] %vm384_vm8, %v734_v7 }
 0x316 PF: > { %s772_s26 = sand.u32 1, %s1023_s21   ;;  %p1367_p12 = scmp.ne.s32.totalorder %s1353_s10, 0 }
 0x317   : > { %p1368_p1 = scmp.ge.s32.totalorder %s1035_s24, 2  ;;  %s773_s25 = scalar_lea.sflag [#allocation6], %s772_s26 }
 0x319   : > { %p887_p3 = pnand %p1368_p1, %p1367_p12 }
 0x31b   : > { %p888_p5 = pneg %p887_p3 }
 0x31d   : > { %1018 = dma.done.wait (%p888_p5), %s773_s25, 1024  }
 0x31e   : > { %1020 = vsyncadd (%p888_p5), %s773_s25, 4294966272  ;;  %p20_p8 = scmp.ge.s32.totalorder %s1110_s27, 4   ;;  %s1369_s21 = smov %s1027_s22 }
 0x31f   : > { %s1370_s22 = smov %s1031_s23  ;;  %s1371_s23 = smov %s1122_s30 }
 0x320   : > { %s1372_s24 = smov %s1110_s27  ;;  %22 = sbr.rel (!%p20_p8) target bundleno = 5 (0x5), region = 97 }
 0x325   :  { %785 = vsyncpa [#allocation5], 1 }
 0x326   :  { %787 = vsyncpa [#allocation5 + $0x1], 1 }
 0x327   :  { %788 = vsyncpa [#allocation6], 1 }
 0x328   :  { %790 = vsyncpa [#allocation6 + $0x1], 1 }

</bundles_post_ra>
